<compile_context>
chip_gen: v5e
topology: v5e:2x2
jax: 0.10.0
libtpu: 0.0.40
codegen_flags: <defaults>
</compile_context>

<pallas_src>
import functools

import jax
import jax.numpy as jnp
from jax.experimental import pallas as pl
from jax.experimental.pallas import tpu as pltpu

_LANE = 128
_SUBLANE = 8


def _sigmoid_beta_kernel(x_ref, o_ref, *, alpha):
    # Compute in f32 (EUP exp on its native width), cast back on store.
    x = x_ref[...].astype(jnp.float32)
    o_ref[...] = jax.nn.sigmoid(alpha * x).astype(o_ref.dtype)


def _choose_slab(n):
    """Pick (rows, cols) with cols % 128 == 0; prefer rows % 8 == 0 (tileable),
    then the widest cols (lane-dense stores). Returns None if n % 128 != 0."""
    candidates = []
    for cols in (8192, 4096, 2048, 1024, 512, 256, 128):
        if n % cols == 0:
            candidates.append((n // cols, cols))
    if not candidates:
        return None
    for rows, cols in candidates:
        if rows % _SUBLANE == 0:
            return rows, cols
    return candidates[0]


def _sigmoid_beta_call(x2d, alpha):
    rows, cols = x2d.shape
    itemsize = jnp.dtype(x2d.dtype).itemsize
    n = rows * cols

    # ~2 MiB per tile: amortizes the ~0.35 us per-grid-step overhead while the
    # double-buffered (in + out) footprint stays at ~8 MiB on every generation.
    target_bytes = 2 * 1024 * 1024
    if rows % _SUBLANE == 0:
        tile_rows = max(_SUBLANE,
                        (target_bytes // (cols * itemsize)) // _SUBLANE * _SUBLANE)
        tile_rows = min(tile_rows, rows)
        # Keep >= 2 grid steps when possible so v7x's 2 TensorCores both work.
        if tile_rows == rows and rows >= 2 * _SUBLANE:
            tile_rows = max(_SUBLANE, (rows // 2) // _SUBLANE * _SUBLANE)
    else:
        tile_rows = rows  # full-dim block (allowed even when not a multiple of 8)

    grid = (pl.cdiv(rows, tile_rows),)
    kernel = functools.partial(_sigmoid_beta_kernel, alpha=float(alpha))

    return pl.pallas_call(
        kernel,
        out_shape=jax.ShapeDtypeStruct((rows, cols), x2d.dtype),
        grid=grid,
        in_specs=[pl.BlockSpec((tile_rows, cols), lambda i: (i, 0))],
        out_specs=pl.BlockSpec((tile_rows, cols), lambda i: (i, 0)),
        compiler_params=pltpu.CompilerParams(
            dimension_semantics=("parallel",),
            vmem_limit_bytes=32 * 1024 * 1024,
        ),
        cost_estimate=pl.CostEstimate(
            flops=n, transcendentals=n, bytes_accessed=2 * n * itemsize),
    )(x2d)


def sigmoid_beta_forward(x, alpha):
    """JAX/Pallas equivalent of sigmoid_beta.forward.

    x: any-shape float array (NCHW in the demo).
    alpha: python float (module parameter, fixed at construction time).
    """
    # Mirrors `if self.alpha == 0.0: return x` (alpha is a static parameter).
    if float(alpha) == 0.0:
        return x

    orig_shape = x.shape
    n = x.size

    slab = _choose_slab(n)
    if slab is not None:
        # Pad-free path: reshape into a lane-dense slab, run, reshape back.
        rows, cols = slab
        out2d = _sigmoid_beta_call(x.reshape(rows, cols), alpha)
        return out2d.reshape(orig_shape)

    # Fallback for element counts not divisible by 128: pad the flat tail to a
    # full (8,128) tile and slice it back off.  Costs one extra HBM round trip
    # but only triggers for awkward sizes.
    flat = x.reshape(-1)
    tile_elems = _SUBLANE * _LANE
    n_pad = ((n + tile_elems - 1) // tile_elems) * tile_elems
    flat = jnp.pad(flat, (0, n_pad - n))
    out2d = _sigmoid_beta_call(flat.reshape(n_pad // _LANE, _LANE), alpha)
    return out2d.reshape(-1)[:n].reshape(orig_shape)


if __name__ == "__main__":
    # Deterministic parameter init (matches nn.Parameter(torch.tensor(alpha)))
    alpha = 1.0

    # Small NCHW input, deterministic
    key = jax.random.PRNGKey(0)
    x = jax.random.normal(key, (2, 4, 16, 16), dtype=jnp.float32)

    y = sigmoid_beta_forward(x, alpha)
    y = jax.block_until_ready(y)

    # Sanity check against plain JAX reference
    ref = jax.nn.sigmoid(alpha * x)
    assert y.shape == x.shape and y.dtype == x.dtype
    assert jnp.max(jnp.abs(y - ref)) < 1e-6

    print("KERNEL_OK")
</pallas_src>

<mosaic_0001>
module attributes {stable_mosaic.version = 11 : i64} {
  func.func @_sigmoid_beta_kernel(%arg0: i32, %arg1: memref<8x256xf32, #tpu.memory_space<vmem>>, %arg2: memref<8x256xf32, #tpu.memory_space<vmem>>) attributes {dimension_semantics = [#tpu.dimension_semantics<parallel>], iteration_bounds = array<i64: 1>, scalar_prefetch = 0 : i64, scratch_operands = 0 : i64, tpu.core_type = #tpu.core_type<tc>, window_params = [{transform_indices = @transform_0, window_bounds = array<i64: 8, 256>}, {transform_indices = @transform_1, window_bounds = array<i64: 8, 256>}]} {
    %c0 = arith.constant 0 : index
    %c0_0 = arith.constant 0 : index
    %0 = vector.load %arg1[%c0, %c0_0] : memref<8x256xf32, #tpu.memory_space<vmem>>, vector<8x256xf32>
    %cst = arith.constant 1.000000e+00 : f32
    %1 = vector.broadcast %cst : f32 to vector<8x256xf32>
    %2 = arith.mulf %1, %0 : vector<8x256xf32>
    %3 = arith.negf %2 : vector<8x256xf32>
    %4 = math.exp %3 : vector<8x256xf32>
    %cst_1 = arith.constant 1.000000e+00 : f32
    %5 = vector.broadcast %cst_1 : f32 to vector<8x256xf32>
    %6 = arith.addf %5, %4 : vector<8x256xf32>
    %7 = arith.divf %5, %6 : vector<8x256xf32>
    %c0_2 = arith.constant 0 : index
    %c0_3 = arith.constant 0 : index
    %8 = vector.load %arg2[%c0_2, %c0_3] : memref<8x256xf32, #tpu.memory_space<vmem>>, vector<8x256xf32>
    tpu.vector_store %arg2[%c0_2, %c0_3], %7 {strides = array<i32>} : memref<8x256xf32, #tpu.memory_space<vmem>>, vector<8x256xf32>,
    return
  }
  func.func @transform_0(%arg0: i32) -> (i32, i32) {
    %c0_i32 = arith.constant 0 : i32
    %c0_i32_0 = arith.constant 0 : i32
    return %arg0, %c0_i32 : i32, i32
  }
  func.func @transform_1(%arg0: i32) -> (i32, i32) {
    %c0_i32 = arith.constant 0 : i32
    %c0_i32_0 = arith.constant 0 : i32
    return %arg0, %c0_i32 : i32, i32
  }
}

</mosaic_0001>

<bundles_post_ra>
// kernel: tpu_custom_call.1
= control target key start
LH: loop header
LB: loop body
LE: loop exit
PB: predicated region body
PF: predicated region fallthrough
CT: control target
= control target key end

     0   :  { %6 = vsyncpa [#allocation3], 0  ;;  %s164_s0 = inlined_call_operand.hbm [shape: f32[8,256], index: 0, kind: input, shape index: {}]   ;;  %s165_s1 = inlined_call_operand.hbm [shape: f32[8,256], index: 1, kind: output, shape index: {}]  }
   0x1   :  { %7 = vsyncpa [#allocation4], 0  ;;  %s13_s8 = sshll.u32 %s164_s0, 4  ;;  %s146_s9 = smov [#allocation2]   ;;  %s14_s8 = int_to_ptr.hbm [resolvable:$true] %s13_s8 }
   0x2   :  { %s15_s10 = sshll.u32 %s146_s9, 4  ;;  %s16_s10 = int_to_ptr.vmem [resolvable:$true] %s15_s10 }
   0x3   :  { %18 = dma.hbm_to_vmem [thread:$0]  %s14_s8, 256, %s16_s10, [#allocation3]  }
   0x4   :  { %142 = dma.done.wait [#allocation3], 256  }
   0x5   :  { %143 = vsyncadd [#allocation3], 4294967040  ;;  %v23_v0 = vld [vmem:[#allocation2] sm:$0xff]  ;;  %v24_v1 = vld [vmem:[#allocation2 + $0x8] sm:$0xff]  ;;  %s147_s0 = smov [#allocation5]   ;;  %s72_s14 = sshll.u32 %s165_s1, 4  ;;  %s73_s14 = int_to_ptr.hbm [resolvable:$true] %s72_s14 }
   0x6   :  { %v82_v2 = vmul.f32 -1.442695, %v23_v0  ;;  %v83_v3 = vmul.f32 -1.442695, %v24_v1  ;;  %s70_s11 = sshll.u32 %s147_s0, 4  ;;  %s71_s11 = int_to_ptr.vmem [resolvable:$true] %s70_s11 }
   0x8   :  { %86 = vpow2.f32 %v82_v2 }
   0x9   :  { %88 = vpow2.f32 %v83_v3 }
   0xe   :  { %v87_v4 = vpop.eup %86 }
   0xf   :  { %v89_v5 = vpop.eup %88  ;;  %v31_v6 = vadd.f32 1.0, %v87_v4 }
  0x10   :  { %v32_v7 = vadd.f32 1.0, %v89_v5 }
  0x11   :  { %90 = vrcp.f32 %v31_v6  ;;  %vm38_vm0 = vweird.f32 %v31_v6  ;;  %v44_v11 = vand.u32 2147483648, %v31_v6  ;;  %v42_v14 = vand.u32 2147483647, %v31_v6 }
  0x12   :  { %92 = vrcp.f32 %v32_v7  ;;  %v59_v15 = vand.u32 2147483648, %v32_v7  ;;  %vm53_vm2 = vweird.f32 %v32_v7  ;;  %v57_v17 = vand.u32 2147483647, %v32_v7 }
  0x13   :  { %v45_v19 = vor.u32 1.1754944e-38, %v44_v11  ;;  %vm43_vm5 = vcmp.eq.f32.partialorder %v42_v14, 8.507059e+37 }
  0x14   :  { %v60_v22 = vor.u32 1.1754944e-38, %v59_v15  ;;  %vm58_vm7 = vcmp.eq.f32.partialorder %v57_v17, 8.507059e+37 }
  0x17   :  { %v91_v8 = vpop.eup %90 }
  0x18   :  { %v93_v9 = vpop.eup %92  ;;  %v34_v10 = vmul.f32 %v91_v8, %v31_v6  ;;  %vm39_vm1 = vweird.f32 %v91_v8 }
  0x19   :  { %v49_v12 = vmul.f32 %v93_v9, %v32_v7  ;;  %vm54_vm3 = vweird.f32 %v93_v9  ;;  %vm40_vm4 = vmor %vm38_vm0, %vm39_vm1 }
  0x1a   :  { %v35_v13 = vsub.f32 1.0, %v34_v10  ;;  %vm55_vm6 = vmor %vm53_vm2, %vm54_vm3 }
  0x1b   :  { %v50_v16 = vsub.f32 1.0, %v49_v12 }
  0x1c   :  { %v36_v18 = vmul.f32 %v91_v8, %v35_v13 }
  0x1d   :  { %v51_v20 = vmul.f32 %v93_v9, %v50_v16 }
  0x1e   :  { %v37_v21 = vadd.f32 %v91_v8, %v36_v18 }
  0x1f   :  { %v52_v23 = vadd.f32 %v93_v9, %v51_v20 }
  0x20   :  { %v41_v24 = vsel %vm40_vm4, %v91_v8, %v37_v21 }
  0x21   :  { %v46_v25 = vsel %vm43_vm5, %v45_v19, %v41_v24  ;;  %v56_v26 = vsel %vm55_vm6, %v93_v9, %v52_v23 }
  0x22   :  { %63 = vst [vmem:[#allocation5] sm:$0xff] %v46_v25  ;;  %v61_v27 = vsel %vm58_vm7, %v60_v22, %v56_v26 }
  0x23   :  { %64 = vst [vmem:[#allocation5 + $0x8] sm:$0xff] %v61_v27 }
  0x24   :  { %75 = dma.vmem_to_hbm [thread:$0]  %s71_s11, 256, %s73_s14, [#allocation4]  }
  0x25   :  { %144 = dma.done.wait [#allocation4], 256  }
  0x26   :  { %145 = vsyncadd [#allocation4], 4294967040 }
  0x27   :  { %80 = vsyncpa [#allocation3], 1 }
  0x28   :  { %81 = vsyncpa [#allocation4], 1 }

</bundles_post_ra>
